<compile_context>
chip_gen: v6e
topology: v6e:2x2x1
jax: 0.10.0
libtpu: 0.0.40
codegen_flags: <defaults>
</compile_context>

<pallas_src>
import math

import jax
import jax.numpy as jnp
from jax.experimental import pallas as pl
from jax.experimental.pallas import tpu as pltpu

_C = (1.16145124, -1.50204118, 0.58629921)


# ---------------------------------------------------------------------------
# Kernels
# ---------------------------------------------------------------------------
def _vdrop_kernel_tpu(seed_ref, alpha_ref, x_ref, out_ref):
    # Two independent seed words (call seed, tile index): tile streams stay
    # independent across nearby call seeds and across different tile counts.
    pltpu.prng_seed(seed_ref[0], pl.program_id(0))
    # TODO(synk): if v7x profiling shows the single EUP slot binding (the
    # uniform->normal transform), draw eps in bf16 on v6e/v7x and upcast.
    eps = pltpu.stateful_normal(x_ref.shape, jnp.float32)
    xf = x_ref[...].astype(jnp.float32)
    out_ref[...] = (xf * eps * alpha_ref[...]).astype(out_ref.dtype)


def _vdrop_kernel_fallback(alpha_ref, x_ref, eps_ref, out_ref):
    # Non-TPU / interpret path: epsilon precomputed in the wrapper.
    xf = x_ref[...].astype(jnp.float32)
    out_ref[...] = (xf * eps_ref[...] * alpha_ref[...]).astype(out_ref.dtype)


# ---------------------------------------------------------------------------
# Tiling helpers
# ---------------------------------------------------------------------------
def _tile_budget_bytes():
    """VMEM budget for the double-buffered tile working set, per generation."""
    cap = 64 << 20                      # conservative default (v7x physical)
    try:
        cap = int(pltpu.get_tpu_info().vmem_capacity_bytes)
    except Exception:
        pass
    # ~half of physical VMEM for the pipelined tiles:
    #   v7x (64 MiB) -> 32 MiB; v5e/v6e (128 MiB) -> 48 MiB (capped).
    return min(cap // 2, 48 << 20)


def _row_tile(n_rows, d, io_bytes_per_elem, vmem_budget_bytes, min_steps=4):
    """Rows per tile: fit the double-buffered budget AND keep >= min_steps."""
    per_row = d * io_bytes_per_elem
    rows_budget = max(8, vmem_budget_bytes // (2 * per_row))   # 2 = double buffer
    rows_split = pl.cdiv(n_rows, min_steps)                    # pipeline/megacore
    tb = min(rows_budget, rows_split)
    if tb >= n_rows:
        return int(n_rows)
    return int(min(n_rows, max(8, (tb // 8) * 8)))             # keep (8,128) tiling


# ---------------------------------------------------------------------------
# Wrapper
# ---------------------------------------------------------------------------
def variational_dropout(x, log_alpha, *, max_alpha, seed=0, c=_C):
    """Forward pass (training branch). x: (..., D); log_alpha: (D,).

    Returns (x * (epsilon * alpha), kld) with epsilon ~ N(0, 1).
    Output dtype matches x.dtype (PyTorch preserves the input dtype).
    """
    orig_shape = x.shape
    out_dtype = x.dtype
    d = int(orig_shape[-1])
    b = 1
    for s in orig_shape[:-1]:
        b *= int(s)

    # --- parameter path (D elements, independent of x): plain JAX -----------
    la = jnp.minimum(log_alpha.astype(jnp.float32), jnp.float32(max_alpha))
    alpha = jnp.exp(la)
    kld = jnp.mean(-(0.5 * la + c[0] * alpha + c[1] * alpha * alpha
                     + c[2] * alpha * alpha * alpha))

    # --- lane-densify: fold rows into the last dim if D is not lane-aligned --
    fold = 1
    if d % 128 != 0:
        cand = 128 // math.gcd(d, 128)
        if cand > 1 and b % cand == 0:
            fold = cand
        # TODO(synk): pad rows when b % fold != 0 so narrow-D outputs still get
        # unmasked full-lane stores.
    d_eff = d * fold
    b_eff = b // fold

    x2 = x.reshape(b_eff, d_eff)                         # no dtype cast: keep x.dtype
    alpha_row = jnp.tile(alpha, fold).reshape(1, d_eff)  # f32; only D*fold elements

    on_tpu = jax.default_backend() == "tpu"
    elem_bytes = int(jnp.dtype(out_dtype).itemsize)
    io_bytes = 2 * elem_bytes + (0 if on_tpu else 4)     # x + out (+ f32 eps fallback)

    tb = _row_tile(b_eff, d_eff, io_bytes, _tile_budget_bytes())
    grid = (pl.cdiv(b_eff, tb),)

    # index_maps receive (grid_i, *scalar_prefetch_refs); *_ absorbs the seed ref.
    alpha_spec = pl.BlockSpec((1, d_eff), lambda i, *_: (0, 0))
    row_spec = pl.BlockSpec((tb, d_eff), lambda i, *_: (i, 0))
    out_shape = jax.ShapeDtypeStruct((b_eff, d_eff), out_dtype)

    # Right-size the VMEM limit to the real double-buffered footprint + slack.
    footprint = 2 * tb * d_eff * io_bytes + 2 * d_eff * 4
    vmem_limit = int(max(footprint + (4 << 20), 16 << 20))

    n = b_eff * d_eff
    cost = pl.CostEstimate(flops=2 * n, transcendentals=3 * n,
                           bytes_accessed=n * 2 * elem_bytes + d_eff * 4)

    if on_tpu:
        seed_arr = jnp.asarray([seed], dtype=jnp.int32)
        out2 = pl.pallas_call(
            _vdrop_kernel_tpu,
            out_shape=out_shape,
            grid_spec=pltpu.PrefetchScalarGridSpec(
                num_scalar_prefetch=1,
                grid=grid,
                in_specs=[alpha_spec, row_spec],
                out_specs=row_spec,
            ),
            compiler_params=pltpu.CompilerParams(
                dimension_semantics=("parallel",),
                vmem_limit_bytes=vmem_limit,
            ),
            cost_estimate=cost,
        )(seed_arr, alpha_row, x2)
    else:
        # TODO(synk): in-kernel TPU PRNG (pltpu.prng_seed/stateful_normal) has no
        # CPU/interpret lowering; draw epsilon with jax.random on non-TPU backends.
        eps = jax.random.normal(jax.random.PRNGKey(int(seed)), (b_eff, d_eff),
                                dtype=jnp.float32)
        out2 = pl.pallas_call(
            _vdrop_kernel_fallback,
            out_shape=out_shape,
            grid=grid,
            in_specs=[alpha_spec, row_spec, row_spec],
            out_specs=row_spec,
        )(alpha_row, x2, eps)

    return out2.reshape(orig_shape), kld


# ---------------------------------------------------------------------------
# Demo / self-check
# ---------------------------------------------------------------------------
if __name__ == "__main__":
    # Deterministic parameter init mirroring __init__(prob, dimension).
    prob = 0.4
    dimension = 128
    batch = 8

    alpha0 = prob / (1.0 - prob) if prob <= 0.5 else prob / (1.0 - 0.49)
    max_alpha = alpha0
    log_alpha = jnp.log(jnp.ones((dimension,), dtype=jnp.float32) * alpha0)

    key = jax.random.PRNGKey(0)
    x = jax.random.normal(key, (batch, dimension), dtype=jnp.float32)

    out, kld = variational_dropout(x, log_alpha, max_alpha=max_alpha, seed=1234)
    jax.block_until_ready((out, kld))

    # Deterministic check: KL term against a pure-JAX reference.
    la_ref = jnp.minimum(log_alpha, max_alpha)
    a_ref = jnp.exp(la_ref)
    kld_ref = jnp.mean(-(0.5 * la_ref + _C[0] * a_ref
                         + _C[1] * a_ref ** 2 + _C[2] * a_ref ** 3))
    assert out.shape == x.shape
    assert out.dtype == x.dtype
    assert jnp.allclose(kld, kld_ref, rtol=1e-5, atol=1e-6)
    assert bool(jnp.all(jnp.isfinite(out)))

    # Exercise the reduced-precision I/O path (bf16 in -> bf16 out).
    x_bf16 = x.astype(jnp.bfloat16)
    out_bf, kld_bf = variational_dropout(x_bf16, log_alpha,
                                         max_alpha=max_alpha, seed=7)
    jax.block_until_ready((out_bf, kld_bf))
    assert out_bf.dtype == jnp.bfloat16 and out_bf.shape == x_bf16.shape
    assert bool(jnp.all(jnp.isfinite(out_bf.astype(jnp.float32))))

    print("KERNEL_OK")
</pallas_src>

<mosaic_0001>
module attributes {stable_mosaic.version = 11 : i64} {
  func.func @_vdrop_kernel_fallback(%arg0: i32, %arg1: memref<1x128xf32, #tpu.memory_space<vmem>>, %arg2: memref<8x128xf32, #tpu.memory_space<vmem>>, %arg3: memref<8x128xf32, #tpu.memory_space<vmem>>, %arg4: memref<8x128xf32, #tpu.memory_space<vmem>>) attributes {dimension_semantics = [#tpu.dimension_semantics<arbitrary>], iteration_bounds = array<i64: 1>, scalar_prefetch = 0 : i64, scratch_operands = 0 : i64, tpu.core_type = #tpu.core_type<tc>, window_params = [{pipeline_mode = #tpu.pipeline_mode<synchronous>, transform_indices = @transform_0, window_bounds = array<i64: 1, 128>}, {transform_indices = @transform_1, window_bounds = array<i64: 8, 128>}, {transform_indices = @transform_2, window_bounds = array<i64: 8, 128>}, {transform_indices = @transform_3, window_bounds = array<i64: 8, 128>}]} {
    %c0 = arith.constant 0 : index
    %c0_0 = arith.constant 0 : index
    %0 = vector.load %arg2[%c0, %c0_0] : memref<8x128xf32, #tpu.memory_space<vmem>>, vector<8x128xf32>
    %c0_1 = arith.constant 0 : index
    %c0_2 = arith.constant 0 : index
    %1 = vector.load %arg3[%c0_1, %c0_2] : memref<8x128xf32, #tpu.memory_space<vmem>>, vector<8x128xf32>
    %2 = arith.mulf %0, %1 : vector<8x128xf32>
    %c0_3 = arith.constant 0 : index
    %c0_4 = arith.constant 0 : index
    %3 = vector.load %arg1[%c0_3, %c0_4] : memref<1x128xf32, #tpu.memory_space<vmem>>, vector<1x128xf32>
    %4 = vector.broadcast %3 : vector<1x128xf32> to vector<8x128xf32>
    %5 = arith.mulf %2, %4 : vector<8x128xf32>
    %c0_5 = arith.constant 0 : index
    %c0_6 = arith.constant 0 : index
    %6 = vector.load %arg4[%c0_5, %c0_6] : memref<8x128xf32, #tpu.memory_space<vmem>>, vector<8x128xf32>
    tpu.vector_store %arg4[%c0_5, %c0_6], %5 {strides = array<i32>} : memref<8x128xf32, #tpu.memory_space<vmem>>, vector<8x128xf32>,
    return
  }
  func.func @transform_0(%arg0: i32) -> (i32, i32) {
    %c0_i32 = arith.constant 0 : i32
    %c0_i32_0 = arith.constant 0 : i32
    %c0_i32_1 = arith.constant 0 : i32
    return %c0_i32, %c0_i32_0 : i32, i32
  }
  func.func @transform_1(%arg0: i32) -> (i32, i32) {
    %c0_i32 = arith.constant 0 : i32
    %c0_i32_0 = arith.constant 0 : i32
    return %arg0, %c0_i32 : i32, i32
  }
  func.func @transform_2(%arg0: i32) -> (i32, i32) {
    %c0_i32 = arith.constant 0 : i32
    %c0_i32_0 = arith.constant 0 : i32
    return %arg0, %c0_i32 : i32, i32
  }
  func.func @transform_3(%arg0: i32) -> (i32, i32) {
    %c0_i32 = arith.constant 0 : i32
    %c0_i32_0 = arith.constant 0 : i32
    return %arg0, %c0_i32 : i32, i32
  }
}

</mosaic_0001>

<bundles_post_ra>
// kernel: tpu_custom_call.1
= control target key start
LH: loop header
LB: loop body
LE: loop exit
PB: predicated region body
PF: predicated region fallthrough
CT: control target
= control target key end

     0   :  { %8 = vsyncpa [#allocation3], 0  ;;  %s205_s0 = inlined_call_operand.hbm [shape: f32[1,128], index: 0, kind: input, shape index: {}]   ;;  %s206_s1 = inlined_call_operand.hbm [shape: f32[8,128], index: 1, kind: input, shape index: {}]   ;;  %s207_s2 = inlined_call_operand.hbm [shape: f32[8,128], index: 2, kind: input, shape index: {}]   ;;  %s208_s3 = inlined_call_operand.hbm [shape: f32[8,128], index: 3, kind: output, shape index: {}]  }
   0x1   :  { %9 = vsyncpa [#allocation6], 0 }
   0x2   :  { %10 = vsyncpa [#allocation4], 0  ;;  %s169_s12 = smov [#allocation5]   ;;  %s170_s14 = smov [#allocation2]  }
   0x3   :  { %s27_s13 = sshll.u32 %s169_s12, 4  ;;  %s17_s15 = sshll.u32 %s170_s14, 4  ;;  %s28_s13 = int_to_ptr.vmem [resolvable:$true] %s27_s13  ;;  %s18_s15 = int_to_ptr.vmem [resolvable:$true] %s17_s15 }
   0x4   :  { %s91_s16 = scalar_lea.vmem %s28_s13, 128  ;;  %p96_p1 = scmp.lt.s32.totalorder %s28_s13, %s28_s13 }
   0x5   :  { %p92_p0 = scmp.ne.s32.totalorder %s28_s13, %s91_s16  ;;  %p97_p2 = scmp.lt.s32.totalorder %s91_s16, %s91_s16 }
   0x7   :  { %p98_p3 = por %p97_p2, %p96_p1 }
   0x9   :  { %p99_p4 = pnand %p98_p3, %p92_p0 }
   0xb   :  { %102 = shalt.err (!%p99_p4)
}
   0xc   :  { %30 = dma.hbm_to_vmem [thread:$0]  %s206_s1, 128, %s28_s13, [#allocation6]  }
   0xd   :  { %s111_s19 = scalar_lea.vmem %s18_s15, 16  ;;  %s115_s20 = scalar_lea.vmem %s18_s15, 32 }
   0xe   :  { %p112_p5 = scmp.ne.s32.totalorder %s18_s15, %s111_s19  ;;  %p116_p6 = scmp.lt.s32.totalorder %s18_s15, %s18_s15 }
   0xf   :  { %p117_p7 = scmp.lt.s32.totalorder %s115_s20, %s111_s19 }
  0x11   :  { %p118_p8 = por %p117_p7, %p116_p6 }
  0x13   :  { %p119_p9 = pnand %p118_p8, %p112_p5 }
  0x15   :  { %122 = shalt.err (!%p119_p9)
}
  0x16   :  { %20 = dma.hbm_to_vmem [thread:$0]  %s205_s0, 16, %s18_s15, [#allocation3]  }
  0x17   :  { %s171_s23 = smov [#allocation7]  }
  0x18   :  { %s37_s24 = sshll.u32 %s171_s23, 4  ;;  %s38_s24 = int_to_ptr.vmem [resolvable:$true] %s37_s24 }
  0x19   :  { %s131_s25 = scalar_lea.vmem %s38_s24, 128  ;;  %p136_p11 = scmp.lt.s32.totalorder %s38_s24, %s38_s24 }
  0x1a   :  { %p132_p10 = scmp.ne.s32.totalorder %s38_s24, %s131_s25  ;;  %p137_p12 = scmp.lt.s32.totalorder %s131_s25, %s131_s25 }
  0x1c   :  { %p138_p13 = por %p137_p12, %p136_p11 }
  0x1e   :  { %p139_p0 = pnand %p138_p13, %p132_p10 }
  0x20   :  { %142 = shalt.err (!%p139_p0)
}
  0x21   :  { %40 = dma.hbm_to_vmem [thread:$0]  %s207_s2, 128, %s38_s24, [#allocation6]  }
  0x22   :  { %163 = dma.done.wait [#allocation3], 16  }
  0x23   :  { %164 = vsyncadd [#allocation3], 4294967280 }
  0x24   :  { %165 = dma.done.wait [#allocation6], 256  }
  0x25   :  { %166 = vsyncadd [#allocation6], 4294967040  ;;  %v50_v0 = vld [vmem:[#allocation5] sm:$0xff]  ;;  %v51_v1 = vld [vmem:[#allocation7] sm:$0xff]  ;;  %s172_s0 = smov [#allocation8]  }
  0x26   :  { %v78_v2 = vld [vmem:[#allocation2] ss:$0 sm:$0xff]  ;;  %s68_s27 = sshll.u32 %s172_s0, 4  ;;  %v52_v3 = vmul.f32 %v51_v1, %v50_v0  ;;  %s69_s27 = int_to_ptr.vmem [resolvable:$true] %s68_s27 }
  0x27   :  { %s143_s28 = scalar_lea.vmem %s69_s27, 128  ;;  %p148_p2 = scmp.lt.s32.totalorder %s69_s27, %s69_s27 }
  0x28   :  { %v60_v4 = vmul.f32 %v78_v2, %v52_v3  ;;  %p144_p1 = scmp.ne.s32.totalorder %s69_s27, %s143_s28  ;;  %p149_p3 = scmp.lt.s32.totalorder %s143_s28, %s143_s28 }
  0x2a   :  { %61 = vst [vmem:[#allocation8] sm:$0xff] %v60_v4  ;;  %p150_p4 = por %p149_p3, %p148_p2 }
  0x2c   :  { %p151_p5 = pnand %p150_p4, %p144_p1 }
  0x2e   :  { %154 = shalt.err (!%p151_p5)
}
  0x2f   :  { %71 = dma.vmem_to_hbm [thread:$0]  %s69_s27, 128, %s208_s3, [#allocation4]  }
  0x30   :  { %167 = dma.done.wait [#allocation4], 128  }
  0x31   :  { %168 = vsyncadd [#allocation4], 4294967168 }
  0x32   :  { %75 = vsyncpa [#allocation3], 1 }
  0x33   :  { %76 = vsyncpa [#allocation6], 1 }
  0x34   :  { %77 = vsyncpa [#allocation4], 1 }

</bundles_post_ra>
